<compile_context>
chip_gen: v5e
topology: v5e:2x2
jax: 0.10.0
libtpu: 0.0.40
codegen_flags: <defaults>
</compile_context>

<pallas_src>
import jax
import jax.numpy as jnp
from jax.experimental import pallas as pl
from jax.experimental.pallas import tpu as pltpu

INPUT_NUM = 24 * 36 * 3   # 2592
HIDDEN1_NUM = 64
HIDDEN2_NUM = 16
OUTPUT_NUM = 4


def _round_up(n, m):
    return ((n + m - 1) // m) * m


def mlp_kernel(x_ref, w1_ref, b1_ref, w2_ref, b2_ref, w3_ref, b3_ref, o_ref):
    # fc1 + ReLU  (f32 accumulation on the MXU, f32 epilogue)
    h1 = jnp.dot(x_ref[...], w1_ref[...], preferred_element_type=jnp.float32)
    h1 = jnp.maximum(h1 + b1_ref[...], 0.0)
    # fc2 + ReLU
    h2 = jnp.dot(h1.astype(w2_ref.dtype), w2_ref[...],
                 preferred_element_type=jnp.float32)
    h2 = jnp.maximum(h2 + b2_ref[...], 0.0)
    # fc3 (no activation)
    out = jnp.dot(h2.astype(w3_ref.dtype), w3_ref[...],
                  preferred_element_type=jnp.float32)
    o_ref[...] = (out + b3_ref[...]).astype(o_ref.dtype)


def neural_net_forward(x, params, *, block_m=512, use_bf16=False):
    """x: [B, INPUT_NUM] float32.  params: dict of w1,b1,w2,b2,w3,b3."""
    assert x.ndim == 2 and x.shape[1] == INPUT_NUM
    B = x.shape[0]
    w1, b1 = params["w1"], params["b1"]
    w2, b2 = params["w2"], params["b2"]
    w3, b3 = params["w3"], params["b3"]

    if use_bf16:
        # Halve HBM traffic on the dominant x stream; biases/epilogue stay f32.
        x = x.astype(jnp.bfloat16)
        w1 = w1.astype(jnp.bfloat16)
        w2 = w2.astype(jnp.bfloat16)
        w3 = w3.astype(jnp.bfloat16)

    # Batch tile: multiple of 8 (sublane), no larger than needed.
    tm = max(8, _round_up(min(block_m, _round_up(B, 8)), 8))
    b_pad = _round_up(B, tm)
    if b_pad != B:
        x = jnp.pad(x, ((0, b_pad - B), (0, 0)))
    grid = (b_pad // tm,)

    # Scoped-VMEM budget: double-buffered x + out tiles, resident weights,
    # plus headroom for intermediates.  Clamped to sane bounds for all chips.
    x_bytes = jnp.dtype(x.dtype).itemsize
    w_itemsize = jnp.dtype(w1.dtype).itemsize
    weight_bytes = (w1.size + w2.size + w3.size) * w_itemsize \
                   + (b1.size + b2.size + b3.size) * 4
    vmem_limit = int(2 * tm * INPUT_NUM * x_bytes
                     + 2 * tm * OUTPUT_NUM * 4
                     + weight_bytes
                     + (8 << 20))
    vmem_limit = max(32 << 20, min(vmem_limit, 100 << 20))

    out = pl.pallas_call(
        mlp_kernel,
        out_shape=jax.ShapeDtypeStruct((b_pad, OUTPUT_NUM), jnp.float32),
        grid=grid,
        in_specs=[
            # x: streamed in batch tiles (double-buffered by Pallas).
            pl.BlockSpec((tm, INPUT_NUM), lambda i: (i, 0)),
            # Weights / biases: full blocks, VMEM-resident across all steps.
            pl.BlockSpec(w1.shape, lambda i: (0, 0)),
            pl.BlockSpec(b1.shape, lambda i: (0, 0)),
            pl.BlockSpec(w2.shape, lambda i: (0, 0)),
            pl.BlockSpec(b2.shape, lambda i: (0, 0)),
            pl.BlockSpec(w3.shape, lambda i: (0, 0)),
            pl.BlockSpec(b3.shape, lambda i: (0, 0)),
        ],
        out_specs=pl.BlockSpec((tm, OUTPUT_NUM), lambda i: (i, 0)),
        compiler_params=pltpu.CompilerParams(
            dimension_semantics=("parallel",),
            vmem_limit_bytes=vmem_limit,
        ),
    )(x, w1, b1, w2, b2, w3, b3)

    return out[:B] if b_pad != B else out


def init_params(key):
    """Deterministic init mimicking PyTorch Linear's uniform(-1/sqrt(fan_in), +)."""
    def linear(k, fan_in, fan_out):
        kw, kb = jax.random.split(k)
        bound = 1.0 / jnp.sqrt(jnp.float32(fan_in))
        # stored as [in, out] for the kernel's  x @ W  convention
        w = jax.random.uniform(kw, (fan_in, fan_out), jnp.float32, -bound, bound)
        b = jax.random.uniform(kb, (1, fan_out), jnp.float32, -bound, bound)
        return w, b

    k1, k2, k3 = jax.random.split(key, 3)
    w1, b1 = linear(k1, INPUT_NUM, HIDDEN1_NUM)
    w2, b2 = linear(k2, HIDDEN1_NUM, HIDDEN2_NUM)
    w3, b3 = linear(k3, HIDDEN2_NUM, OUTPUT_NUM)
    return {"w1": w1, "b1": b1, "w2": w2, "b2": b2, "w3": w3, "b3": b3}


def reference_forward(x, params):
    h1 = jnp.maximum(x @ params["w1"] + params["b1"], 0.0)
    h2 = jnp.maximum(h1 @ params["w2"] + params["b2"], 0.0)
    return h2 @ params["w3"] + params["b3"]


if __name__ == "__main__":
    key = jax.random.PRNGKey(0)
    kp, kx = jax.random.split(key)
    params = init_params(kp)

    # Small single-tile case (f32, strict tolerance).
    x_small = jax.random.normal(kx, (8, INPUT_NUM), jnp.float32)
    out_small = jax.block_until_ready(neural_net_forward(x_small, params))
    ref_small = reference_forward(x_small, params)
    assert out_small.shape == (8, OUTPUT_NUM)
    assert jnp.allclose(out_small, ref_small, atol=1e-4, rtol=1e-4)

    # Multi-tile + ragged batch case (exercises grid pipelining and padding).
    x_big = jax.random.normal(jax.random.fold_in(kx, 1), (300, INPUT_NUM),
                              jnp.float32)
    out_big = jax.block_until_ready(
        neural_net_forward(x_big, params, block_m=128))
    ref_big = reference_forward(x_big, params)
    assert out_big.shape == (300, OUTPUT_NUM)
    assert jnp.allclose(out_big, ref_big, atol=1e-4, rtol=1e-4)

    # bf16 input/weight path (halves HBM traffic; f32 accumulation).
    out_bf16 = jax.block_until_ready(
        neural_net_forward(x_big, params, block_m=128, use_bf16=True))
    assert jnp.allclose(out_bf16, ref_big, atol=5e-2, rtol=5e-2)

    print("KERNEL_OK")
</pallas_src>

<mosaic_0001>
module attributes {stable_mosaic.version = 11 : i64} {
  func.func @mlp_kernel(%arg0: i32, %arg1: memref<8x2592xf32, #tpu.memory_space<vmem>>, %arg2: memref<2592x64xf32, #tpu.memory_space<vmem>>, %arg3: memref<1x64xf32, #tpu.memory_space<vmem>>, %arg4: memref<64x16xf32, #tpu.memory_space<vmem>>, %arg5: memref<1x16xf32, #tpu.memory_space<vmem>>, %arg6: memref<16x4xf32, #tpu.memory_space<vmem>>, %arg7: memref<1x4xf32, #tpu.memory_space<vmem>>, %arg8: memref<8x4xf32, #tpu.memory_space<vmem>>) attributes {dimension_semantics = [#tpu.dimension_semantics<parallel>], iteration_bounds = array<i64: 1>, scalar_prefetch = 0 : i64, scratch_operands = 0 : i64, tpu.core_type = #tpu.core_type<tc>, window_params = [{transform_indices = @transform_0, window_bounds = array<i64: 8, 2592>}, {pipeline_mode = #tpu.pipeline_mode<synchronous>, transform_indices = @transform_1, window_bounds = array<i64: 2592, 64>}, {pipeline_mode = #tpu.pipeline_mode<synchronous>, transform_indices = @transform_2, window_bounds = array<i64: 1, 64>}, {pipeline_mode = #tpu.pipeline_mode<synchronous>, transform_indices = @transform_3, window_bounds = array<i64: 64, 16>}, {pipeline_mode = #tpu.pipeline_mode<synchronous>, transform_indices = @transform_4, window_bounds = array<i64: 1, 16>}, {pipeline_mode = #tpu.pipeline_mode<synchronous>, transform_indices = @transform_5, window_bounds = array<i64: 16, 4>}, {pipeline_mode = #tpu.pipeline_mode<synchronous>, transform_indices = @transform_6, window_bounds = array<i64: 1, 4>}, {transform_indices = @transform_7, window_bounds = array<i64: 8, 4>}]} {
    %c0 = arith.constant 0 : index
    %c0_0 = arith.constant 0 : index
    %0 = vector.load %arg1[%c0, %c0_0] : memref<8x2592xf32, #tpu.memory_space<vmem>>, vector<8x2592xf32>
    %c0_1 = arith.constant 0 : index
    %c0_2 = arith.constant 0 : index
    %1 = vector.load %arg2[%c0_1, %c0_2] : memref<2592x64xf32, #tpu.memory_space<vmem>>, vector<2592x64xf32>
    %cst = arith.constant dense<0.000000e+00> : vector<8x64xf32>
    %2 = tpu.matmul %0, %1, %cst {dimension_numbers = #tpu.dot_dimension_numbers<[1], [0], [0], [1], [0, 0, 1, 1], [], []>} : vector<8x2592xf32>, vector<2592x64xf32>, vector<8x64xf32> -> vector<8x64xf32>
    %c0_3 = arith.constant 0 : index
    %c0_4 = arith.constant 0 : index
    %3 = vector.load %arg3[%c0_3, %c0_4] : memref<1x64xf32, #tpu.memory_space<vmem>>, vector<1x64xf32>
    %4 = vector.broadcast %3 : vector<1x64xf32> to vector<8x64xf32>
    %5 = arith.addf %2, %4 : vector<8x64xf32>
    %cst_5 = arith.constant 0.000000e+00 : f32
    %6 = vector.broadcast %cst_5 : f32 to vector<8x64xf32>
    %7 = arith.maximumf %5, %6 : vector<8x64xf32>
    %c0_6 = arith.constant 0 : index
    %c0_7 = arith.constant 0 : index
    %8 = vector.load %arg4[%c0_6, %c0_7] : memref<64x16xf32, #tpu.memory_space<vmem>>, vector<64x16xf32>
    %cst_8 = arith.constant dense<0.000000e+00> : vector<8x16xf32>
    %9 = tpu.matmul %7, %8, %cst_8 {dimension_numbers = #tpu.dot_dimension_numbers<[1], [0], [0], [1], [0, 0, 1, 1], [], []>} : vector<8x64xf32>, vector<64x16xf32>, vector<8x16xf32> -> vector<8x16xf32>
    %c0_9 = arith.constant 0 : index
    %c0_10 = arith.constant 0 : index
    %10 = vector.load %arg5[%c0_9, %c0_10] : memref<1x16xf32, #tpu.memory_space<vmem>>, vector<1x16xf32>
    %11 = vector.broadcast %10 : vector<1x16xf32> to vector<8x16xf32>
    %12 = arith.addf %9, %11 : vector<8x16xf32>
    %cst_11 = arith.constant 0.000000e+00 : f32
    %13 = vector.broadcast %cst_11 : f32 to vector<8x16xf32>
    %14 = arith.maximumf %12, %13 : vector<8x16xf32>
    %c0_12 = arith.constant 0 : index
    %c0_13 = arith.constant 0 : index
    %15 = vector.load %arg6[%c0_12, %c0_13] : memref<16x4xf32, #tpu.memory_space<vmem>>, vector<16x4xf32>
    %cst_14 = arith.constant dense<0.000000e+00> : vector<8x4xf32>
    %16 = tpu.matmul %14, %15, %cst_14 {dimension_numbers = #tpu.dot_dimension_numbers<[1], [0], [0], [1], [0, 0, 1, 1], [], []>} : vector<8x16xf32>, vector<16x4xf32>, vector<8x4xf32> -> vector<8x4xf32>
    %c0_15 = arith.constant 0 : index
    %c0_16 = arith.constant 0 : index
    %17 = vector.load %arg7[%c0_15, %c0_16] : memref<1x4xf32, #tpu.memory_space<vmem>>, vector<1x4xf32>
    %18 = vector.broadcast %17 : vector<1x4xf32> to vector<8x4xf32>
    %19 = arith.addf %16, %18 : vector<8x4xf32>
    %c0_17 = arith.constant 0 : index
    %c0_18 = arith.constant 0 : index
    %20 = vector.load %arg8[%c0_17, %c0_18] : memref<8x4xf32, #tpu.memory_space<vmem>>, vector<8x4xf32>
    tpu.vector_store %arg8[%c0_17, %c0_18], %19 {strides = array<i32>} : memref<8x4xf32, #tpu.memory_space<vmem>>, vector<8x4xf32>,
    return
  }
  func.func @transform_0(%arg0: i32) -> (i32, i32) {
    %c0_i32 = arith.constant 0 : i32
    %c0_i32_0 = arith.constant 0 : i32
    return %arg0, %c0_i32 : i32, i32
  }
  func.func @transform_1(%arg0: i32) -> (i32, i32) {
    %c0_i32 = arith.constant 0 : i32
    %c0_i32_0 = arith.constant 0 : i32
    %c0_i32_1 = arith.constant 0 : i32
    return %c0_i32, %c0_i32_0 : i32, i32
  }
  func.func @transform_2(%arg0: i32) -> (i32, i32) {
    %c0_i32 = arith.constant 0 : i32
    %c0_i32_0 = arith.constant 0 : i32
    %c0_i32_1 = arith.constant 0 : i32
    return %c0_i32, %c0_i32_0 : i32, i32
  }
  func.func @transform_3(%arg0: i32) -> (i32, i32) {
    %c0_i32 = arith.constant 0 : i32
    %c0_i32_0 = arith.constant 0 : i32
    %c0_i32_1 = arith.constant 0 : i32
    return %c0_i32, %c0_i32_0 : i32, i32
  }
  func.func @transform_4(%arg0: i32) -> (i32, i32) {
    %c0_i32 = arith.constant 0 : i32
    %c0_i32_0 = arith.constant 0 : i32
    %c0_i32_1 = arith.constant 0 : i32
    return %c0_i32, %c0_i32_0 : i32, i32
  }
  func.func @transform_5(%arg0: i32) -> (i32, i32) {
    %c0_i32 = arith.constant 0 : i32
    %c0_i32_0 = arith.constant 0 : i32
    %c0_i32_1 = arith.constant 0 : i32
    return %c0_i32, %c0_i32_0 : i32, i32
  }
  func.func @transform_6(%arg0: i32) -> (i32, i32) {
    %c0_i32 = arith.constant 0 : i32
    %c0_i32_0 = arith.constant 0 : i32
    %c0_i32_1 = arith.constant 0 : i32
    return %c0_i32, %c0_i32_0 : i32, i32
  }
  func.func @transform_7(%arg0: i32) -> (i32, i32) {
    %c0_i32 = arith.constant 0 : i32
    %c0_i32_0 = arith.constant 0 : i32
    return %arg0, %c0_i32 : i32, i32
  }
}

</mosaic_0001>

<bundles_post_ra>
// kernel: tpu_custom_call.1
= control target key start
LH: loop header
LB: loop body
LE: loop exit
PB: predicated region body
PF: predicated region fallthrough
CT: control target
= control target key end

     0   :  { %vm375_vm0 = vcmask 261120   ;;  %vm812_vm1 = vcmask 523264   ;;  %vm843_vm2 = vcmask 130048   ;;  %vm867_vm3 = vcmask 31744   ;;  %s1996_s1 = inlined_call_operand.vmem [shape: f32[2592,64], index: 1, kind: input, shape index: {}]   ;;  %s1997_s0 = inlined_call_operand.vmem [shape: f32[8,2592], index: 0, kind: input, shape index: {}]   ;;  %s1998_s2 = inlined_call_operand.vmem [shape: f32[1,64], index: 2, kind: input, shape index: {}]   ;;  %s1999_s4 = inlined_call_operand.vmem [shape: f32[1,16], index: 4, kind: input, shape index: {}]   ;;  %s2000_s3 = inlined_call_operand.vmem [shape: f32[64,16], index: 3, kind: input, shape index: {}]   ;;  %s2001_s5 = inlined_call_operand.vmem [shape: f32[16,4], index: 5, kind: input, shape index: {}]   ;;  %s2002_s6 = inlined_call_operand.vmem [shape: f32[1,4], index: 6, kind: input, shape index: {}]   ;;  %s2003_s7 = inlined_call_operand.vmem [shape: f32[8,4], index: 7, kind: output, shape index: {}]  }
   0x1   :  { %v62_v0 = vld [vmem:[%s1996_s1 + $0x78] sm:$0xff]  ;;  %v61_v2 = vld [vmem:[%s1996_s1 + $0x70] sm:$0xff]  ;;  %v60_v6 = vld [vmem:[%s1996_s1 + $0x68] sm:$0xff] }
   0x2   :  { %v94_v1 = vld [vmem:[%s1996_s1 + $0x178] sm:$0xff]  ;;  %379 = vmatpush.msra.mxu0 %v62_v0  ;;  %v93_v4 = vld [vmem:[%s1996_s1 + $0x170] sm:$0xff]  ;;  %v92_v8 = vld [vmem:[%s1996_s1 + $0x168] sm:$0xff] }
   0x3   :  { %419 = vmatpush.msra.mxu2 %v94_v1  ;;  %v78_v3 = vld [vmem:[%s1996_s1 + $0xf8] sm:$0xff]  ;;  %v77_v7 = vld [vmem:[%s1996_s1 + $0xf0] sm:$0xff]  ;;  %v76_v10 = vld [vmem:[%s1996_s1 + $0xe8] sm:$0xff] }
   0x4   :  { %v110_v5 = vld [vmem:[%s1996_s1 + $0x1f8] sm:$0xff]  ;;  %399 = vmatpush.msra.mxu1 %v78_v3  ;;  %380 = vmatpush.msra.mxu0 %v61_v2  ;;  %v109_v9 = vld [vmem:[%s1996_s1 + $0x1f0] sm:$0xff]  ;;  %v59_v11 = vld [vmem:[%s1996_s1 + $0x60] sm:$0xff] }
   0x5   :  { %439 = vmatpush.msra.mxu3 %v110_v5  ;;  %420 = vmatpush.msra.mxu2 %v93_v4  ;;  %v91_v12 = vld [vmem:[%s1996_s1 + $0x160] sm:$0xff]  ;;  %v108_v13 = vld [vmem:[%s1996_s1 + $0x1e8] sm:$0xff]  ;;  %v58_v16 = vld [vmem:[%s1996_s1 + $0x58] sm:$0xff] }
   0x6   :  { %400 = vmatpush.msra.mxu1 %v77_v7  ;;  %381 = vmatpush.msra.mxu0 %v60_v6  ;;  %v75_v14 = vld [vmem:[%s1996_s1 + $0xe0] sm:$0xff]  ;;  %v90_v17 = vld [vmem:[%s1996_s1 + $0x158] sm:$0xff]  ;;  %v57_v20 = vld [vmem:[%s1996_s1 + $0x50] sm:$0xff] }
   0x7   :  { %440 = vmatpush.msra.mxu3 %v109_v9  ;;  %421 = vmatpush.msra.mxu2 %v92_v8  ;;  %v107_v15 = vld [vmem:[%s1996_s1 + $0x1e0] sm:$0xff]  ;;  %v74_v18 = vld [vmem:[%s1996_s1 + $0xd8] sm:$0xff]  ;;  %v89_v21 = vld [vmem:[%s1996_s1 + $0x150] sm:$0xff] }
   0x8   :  { %401 = vmatpush.msra.mxu1 %v76_v10  ;;  %382 = vmatpush.msra.mxu0 %v59_v11  ;;  %v106_v19 = vld [vmem:[%s1996_s1 + $0x1d8] sm:$0xff]  ;;  %v73_v22 = vld [vmem:[%s1996_s1 + $0xd0] sm:$0xff]  ;;  %v56_v24 = vld [vmem:[%s1996_s1 + $0x48] sm:$0xff] }
   0x9   :  { %441 = vmatpush.msra.mxu3 %v108_v13  ;;  %422 = vmatpush.msra.mxu2 %v91_v12  ;;  %v105_v23 = vld [vmem:[%s1996_s1 + $0x1d0] sm:$0xff]  ;;  %v88_v25 = vld [vmem:[%s1996_s1 + $0x148] sm:$0xff]  ;;  %v55_v28 = vld [vmem:[%s1996_s1 + $0x40] sm:$0xff] }
   0xa   :  { %402 = vmatpush.msra.mxu1 %v75_v14  ;;  %383 = vmatpush.msra.mxu0 %v58_v16  ;;  %v72_v26 = vld [vmem:[%s1996_s1 + $0xc8] sm:$0xff]  ;;  %v87_v29 = vld [vmem:[%s1996_s1 + $0x140] sm:$0xff]  ;;  %v54_v32 = vld [vmem:[%s1996_s1 + $0x38] sm:$0xff] }
   0xb   :  { %442 = vmatpush.msra.mxu3 %v107_v15  ;;  %423 = vmatpush.msra.mxu2 %v90_v17  ;;  %v104_v27 = vld [vmem:[%s1996_s1 + $0x1c8] sm:$0xff]  ;;  %v71_v30 = vld [vmem:[%s1996_s1 + $0xc0] sm:$0xff]  ;;  %v86_v33 = vld [vmem:[%s1996_s1 + $0x138] sm:$0xff] }
   0xc   :  { %403 = vmatpush.msra.mxu1 %v74_v18  ;;  %384 = vmatpush.msra.mxu0 %v57_v20  ;;  %v103_v31 = vld [vmem:[%s1996_s1 + $0x1c0] sm:$0xff]  ;;  %v70_v34 = vld [vmem:[%s1996_s1 + $0xb8] sm:$0xff]  ;;  %v53_v36 = vld [vmem:[%s1996_s1 + $0x30] sm:$0xff] }
   0xd   :  { %443 = vmatpush.msra.mxu3 %v106_v19  ;;  %424 = vmatpush.msra.mxu2 %v89_v21  ;;  %v102_v35 = vld [vmem:[%s1996_s1 + $0x1b8] sm:$0xff]  ;;  %v85_v37 = vld [vmem:[%s1996_s1 + $0x130] sm:$0xff]  ;;  %v52_v40 = vld [vmem:[%s1996_s1 + $0x28] sm:$0xff] }
   0xe   :  { %404 = vmatpush.msra.mxu1 %v73_v22  ;;  %385 = vmatpush.msra.mxu0 %v56_v24  ;;  %v69_v38 = vld [vmem:[%s1996_s1 + $0xb0] sm:$0xff]  ;;  %v84_v41 = vld [vmem:[%s1996_s1 + $0x128] sm:$0xff]  ;;  %v51_v44 = vld [vmem:[%s1996_s1 + $0x20] sm:$0xff] }
   0xf   :  { %444 = vmatpush.msra.mxu3 %v105_v23  ;;  %425 = vmatpush.msra.mxu2 %v88_v25  ;;  %v101_v39 = vld [vmem:[%s1996_s1 + $0x1b0] sm:$0xff]  ;;  %v68_v42 = vld [vmem:[%s1996_s1 + $0xa8] sm:$0xff]  ;;  %v83_v45 = vld [vmem:[%s1996_s1 + $0x120] sm:$0xff] }
  0x10   :  { %405 = vmatpush.msra.mxu1 %v72_v26  ;;  %386 = vmatpush.msra.mxu0 %v55_v28  ;;  %v100_v43 = vld [vmem:[%s1996_s1 + $0x1a8] sm:$0xff]  ;;  %v67_v46 = vld [vmem:[%s1996_s1 + $0xa0] sm:$0xff]  ;;  %v50_v48 = vld [vmem:[%s1996_s1 + $0x18] sm:$0xff] }
  0x11   :  { %445 = vmatpush.msra.mxu3 %v104_v27  ;;  %426 = vmatpush.msra.mxu2 %v87_v29  ;;  %v99_v47 = vld [vmem:[%s1996_s1 + $0x1a0] sm:$0xff]  ;;  %v82_v49 = vld [vmem:[%s1996_s1 + $0x118] sm:$0xff]  ;;  %v49_v52 = vld [vmem:[%s1996_s1 + $0x10] sm:$0xff] }
  0x12   :  { %406 = vmatpush.msra.mxu1 %v71_v30  ;;  %387 = vmatpush.msra.mxu0 %v54_v32  ;;  %v66_v50 = vld [vmem:[%s1996_s1 + $0x98] sm:$0xff]  ;;  %v81_v53 = vld [vmem:[%s1996_s1 + $0x110] sm:$0xff]  ;;  %v48_v56 = vld [vmem:[%s1996_s1 + $0x8] sm:$0xff] }
  0x13   :  { %446 = vmatpush.msra.mxu3 %v103_v31  ;;  %427 = vmatpush.msra.mxu2 %v86_v33  ;;  %v98_v51 = vld [vmem:[%s1996_s1 + $0x198] sm:$0xff]  ;;  %v65_v54 = vld [vmem:[%s1996_s1 + $0x90] sm:$0xff]  ;;  %v80_v57 = vld [vmem:[%s1996_s1 + $0x108] sm:$0xff] }
  0x14   :  { %407 = vmatpush.msra.mxu1 %v70_v34  ;;  %388 = vmatpush.msra.mxu0 %v53_v36  ;;  %v97_v55 = vld [vmem:[%s1996_s1 + $0x190] sm:$0xff]  ;;  %v64_v58 = vld [vmem:[%s1996_s1 + $0x88] sm:$0xff]  ;;  %v47_v60 = vld [vmem:[%s1996_s1] sm:$0xff] }
  0x15   :  { %447 = vmatpush.msra.mxu3 %v102_v35  ;;  %428 = vmatpush.msra.mxu2 %v85_v37  ;;  %v96_v59 = vld [vmem:[%s1996_s1 + $0x188] sm:$0xff]  ;;  %v79_v61 = vld [vmem:[%s1996_s1 + $0x100] sm:$0xff]  ;;  %v126_v62 = vld [vmem:[%s1996_s1 + $0x278] sm:$0xff] }
  0x16   :  { %408 = vmatpush.msra.mxu1 %v69_v38  ;;  %389 = vmatpush.msra.mxu0 %v52_v40  ;;  %v158_v63 = vld [vmem:[%s1996_s1 + $0x378] sm:$0xff]  ;;  %v63_v0 = vld [vmem:[%s1996_s1 + $0x80] sm:$0xff]  ;;  %v125_v2 = vld [vmem:[%s1996_s1 + $0x270] sm:$0xff] }
  0x17   :  { %448 = vmatpush.msra.mxu3 %v101_v39  ;;  %429 = vmatpush.msra.mxu2 %v84_v41  ;;  %v95_v1 = vld [vmem:[%s1996_s1 + $0x180] sm:$0xff]  ;;  %v142_v3 = vld [vmem:[%s1996_s1 + $0x2f8] sm:$0xff]  ;;  %v157_v4 = vld [vmem:[%s1996_s1 + $0x370] sm:$0xff] }
  0x18   :  { %409 = vmatpush.msra.mxu1 %v68_v42  ;;  %390 = vmatpush.msra.mxu0 %v51_v44  ;;  %v174_v5 = vld [vmem:[%s1996_s1 + $0x3f8] sm:$0xff]  ;;  %v124_v6 = vld [vmem:[%s1996_s1 + $0x268] sm:$0xff]  ;;  %v141_v7 = vld [vmem:[%s1996_s1 + $0x2f0] sm:$0xff] }
  0x19   :  { %449 = vmatpush.msra.mxu3 %v100_v43  ;;  %430 = vmatpush.msra.mxu2 %v83_v45  ;;  %v156_v8 = vld [vmem:[%s1996_s1 + $0x368] sm:$0xff]  ;;  %v173_v9 = vld [vmem:[%s1996_s1 + $0x3f0] sm:$0xff]  ;;  %v123_v10 = vld [vmem:[%s1996_s1 + $0x260] sm:$0xff] }
  0x1a   :  { %410 = vmatpush.msra.mxu1 %v67_v46  ;;  %391 = vmatpush.msra.mxu0 %v50_v48  ;;  %v140_v11 = vld [vmem:[%s1996_s1 + $0x2e8] sm:$0xff]  ;;  %v155_v12 = vld [vmem:[%s1996_s1 + $0x360] sm:$0xff]  ;;  %v122_v14 = vld [vmem:[%s1996_s1 + $0x258] sm:$0xff] }
  0x1b   :  { %450 = vmatpush.msra.mxu3 %v99_v47  ;;  %431 = vmatpush.msra.mxu2 %v82_v49  ;;  %v172_v13 = vld [vmem:[%s1996_s1 + $0x3e8] sm:$0xff]  ;;  %v139_v15 = vld [vmem:[%s1996_s1 + $0x2e0] sm:$0xff]  ;;  %v154_v16 = vld [vmem:[%s1996_s1 + $0x358] sm:$0xff] }
  0x1c   :  { %411 = vmatpush.msra.mxu1 %v66_v50  ;;  %392 = vmatpush.msra.mxu0 %v49_v52  ;;  %v171_v17 = vld [vmem:[%s1996_s1 + $0x3e0] sm:$0xff]  ;;  %v121_v18 = vld [vmem:[%s1996_s1 + $0x250] sm:$0xff]  ;;  %v138_v19 = vld [vmem:[%s1996_s1 + $0x2d8] sm:$0xff] }
  0x1d   :  { %451 = vmatpush.msra.mxu3 %v98_v51  ;;  %432 = vmatpush.msra.mxu2 %v81_v53  ;;  %v153_v20 = vld [vmem:[%s1996_s1 + $0x350] sm:$0xff]  ;;  %v170_v21 = vld [vmem:[%s1996_s1 + $0x3d8] sm:$0xff]  ;;  %v120_v22 = vld [vmem:[%s1996_s1 + $0x248] sm:$0xff] }
  0x1e   :  { %412 = vmatpush.msra.mxu1 %v65_v54  ;;  %393 = vmatpush.msra.mxu0 %v48_v56  ;;  %v137_v23 = vld [vmem:[%s1996_s1 + $0x2d0] sm:$0xff]  ;;  %v152_v24 = vld [vmem:[%s1996_s1 + $0x348] sm:$0xff]  ;;  %v119_v26 = vld [vmem:[%s1996_s1 + $0x240] sm:$0xff] }
  0x1f   :  { %452 = vmatpush.msra.mxu3 %v97_v55  ;;  %433 = vmatpush.msra.mxu2 %v80_v57  ;;  %v169_v25 = vld [vmem:[%s1996_s1 + $0x3d0] sm:$0xff]  ;;  %v136_v27 = vld [vmem:[%s1996_s1 + $0x2c8] sm:$0xff]  ;;  %v151_v28 = vld [vmem:[%s1996_s1 + $0x340] sm:$0xff] }
  0x20   :  { %413 = vmatpush.msra.mxu1 %v64_v58  ;;  %394 = vmatpush.msra.mxu0 %v47_v60  ;;  %v168_v29 = vld [vmem:[%s1996_s1 + $0x3c8] sm:$0xff]  ;;  %v118_v30 = vld [vmem:[%s1996_s1 + $0x238] sm:$0xff]  ;;  %v135_v31 = vld [vmem:[%s1996_s1 + $0x2c0] sm:$0xff] }
  0x21   :  { %453 = vmatpush.msra.mxu3 %v96_v59  ;;  %434 = vmatpush.msra.mxu2 %v79_v61  ;;  %v150_v32 = vld [vmem:[%s1996_s1 + $0x338] sm:$0xff]  ;;  %v167_v33 = vld [vmem:[%s1996_s1 + $0x3c0] sm:$0xff]  ;;  %v117_v34 = vld [vmem:[%s1996_s1 + $0x230] sm:$0xff] }
  0x22   :  { %459 = vmatpush.msrb.mxu0 %v126_v62  ;;  %414 = vmatpush.msra.mxu1 %v63_v0  ;;  %v134_v35 = vld [vmem:[%s1996_s1 + $0x2b8] sm:$0xff]  ;;  %v149_v36 = vld [vmem:[%s1996_s1 + $0x330] sm:$0xff]  ;;  %v116_v38 = vld [vmem:[%s1996_s1 + $0x228] sm:$0xff] }
  0x23   :  { %499 = vmatpush.msrb.mxu2 %v158_v63  ;;  %454 = vmatpush.msra.mxu3 %v95_v1  ;;  %v166_v37 = vld [vmem:[%s1996_s1 + $0x3b8] sm:$0xff]  ;;  %v133_v39 = vld [vmem:[%s1996_s1 + $0x2b0] sm:$0xff]  ;;  %v148_v40 = vld [vmem:[%s1996_s1 + $0x328] sm:$0xff] }
  0x24   :  { %460 = vmatpush.msrb.mxu0 %v125_v2  ;;  %479 = vmatpush.msrb.mxu1 %v142_v3  ;;  %v165_v41 = vld [vmem:[%s1996_s1 + $0x3b0] sm:$0xff]  ;;  %v115_v42 = vld [vmem:[%s1996_s1 + $0x220] sm:$0xff]  ;;  %v132_v43 = vld [vmem:[%s1996_s1 + $0x2a8] sm:$0xff] }
  0x25   :  { %500 = vmatpush.msrb.mxu2 %v157_v4  ;;  %519 = vmatpush.msrb.mxu3 %v174_v5  ;;  %v147_v44 = vld [vmem:[%s1996_s1 + $0x320] sm:$0xff]  ;;  %v164_v45 = vld [vmem:[%s1996_s1 + $0x3a8] sm:$0xff]  ;;  %v114_v46 = vld [vmem:[%s1996_s1 + $0x218] sm:$0xff] }
  0x26   :  { %461 = vmatpush.msrb.mxu0 %v124_v6  ;;  %480 = vmatpush.msrb.mxu1 %v141_v7  ;;  %v131_v47 = vld [vmem:[%s1996_s1 + $0x2a0] sm:$0xff]  ;;  %v146_v48 = vld [vmem:[%s1996_s1 + $0x318] sm:$0xff]  ;;  %v113_v50 = vld [vmem:[%s1996_s1 + $0x210] sm:$0xff] }
  0x27   :  { %501 = vmatpush.msrb.mxu2 %v156_v8  ;;  %520 = vmatpush.msrb.mxu3 %v173_v9  ;;  %v163_v49 = vld [vmem:[%s1996_s1 + $0x3a0] sm:$0xff]  ;;  %v130_v51 = vld [vmem:[%s1996_s1 + $0x298] sm:$0xff]  ;;  %v145_v52 = vld [vmem:[%s1996_s1 + $0x310] sm:$0xff] }
  0x28   :  { %462 = vmatpush.msrb.mxu0 %v123_v10  ;;  %481 = vmatpush.msrb.mxu1 %v140_v11  ;;  %v162_v53 = vld [vmem:[%s1996_s1 + $0x398] sm:$0xff]  ;;  %v112_v54 = vld [vmem:[%s1996_s1 + $0x208] sm:$0xff]  ;;  %v129_v55 = vld [vmem:[%s1996_s1 + $0x290] sm:$0xff] }
  0x29   :  { %502 = vmatpush.msrb.mxu2 %v155_v12  ;;  %521 = vmatpush.msrb.mxu3 %v172_v13  ;;  %v144_v56 = vld [vmem:[%s1996_s1 + $0x308] sm:$0xff]  ;;  %v161_v57 = vld [vmem:[%s1996_s1 + $0x390] sm:$0xff]  ;;  %v111_v58 = vld [vmem:[%s1996_s1 + $0x200] sm:$0xff] }
  0x2a   :  { %463 = vmatpush.msrb.mxu0 %v122_v14  ;;  %482 = vmatpush.msrb.mxu1 %v139_v15  ;;  %v128_v59 = vld [vmem:[%s1996_s1 + $0x288] sm:$0xff]  ;;  %v143_v60 = vld [vmem:[%s1996_s1 + $0x300] sm:$0xff]  ;;  %v28_v63 = vld [vmem:[%s1997_s0 + $0x10] sm:$0xff] }
  0x2b   :  { %503 = vmatpush.msrb.mxu2 %v154_v16  ;;  %522 = vmatpush.msrb.mxu3 %v171_v17  ;;  %v160_v61 = vld [vmem:[%s1996_s1 + $0x388] sm:$0xff]  ;;  %v26_v62 = vld [vmem:[%s1997_s0] sm:$0xff]  ;;  %v190_v0 = vld [vmem:[%s1996_s1 + $0x478] sm:$0xff] }
  0x2c   :  { %464 = vmatpush.msrb.mxu0 %v121_v18  ;;  %483 = vmatpush.msrb.mxu1 %v138_v19  ;;  %v222_v1 = vld [vmem:[%s1996_s1 + $0x578] sm:$0xff]  ;;  %v127_v2 = vld [vmem:[%s1996_s1 + $0x280] sm:$0xff]  ;;  %v27_v4 = vld [vmem:[%s1997_s0 + $0x8] sm:$0xff] }
  0x2d   :  { %504 = vmatpush.msrb.mxu2 %v153_v20  ;;  %523 = vmatpush.msrb.mxu3 %v170_v21  ;;  %v159_v3 = vld [vmem:[%s1996_s1 + $0x380] sm:$0xff]  ;;  %v29_v5 = vld [vmem:[%s1997_s0 + $0x18] sm:$0xff]  ;;  %v189_v6 = vld [vmem:[%s1996_s1 + $0x470] sm:$0xff] }
  0x2e   :  { %465 = vmatpush.msrb.mxu0 %v120_v22  ;;  %484 = vmatpush.msrb.mxu1 %v137_v23  ;;  %v206_v7 = vld [vmem:[%s1996_s1 + $0x4f8] sm:$0xff]  ;;  %v221_v8 = vld [vmem:[%s1996_s1 + $0x570] sm:$0xff]  ;;  %v188_v10 = vld [vmem:[%s1996_s1 + $0x468] sm:$0xff] }
  0x2f   :  { %505 = vmatpush.msrb.mxu2 %v152_v24  ;;  %524 = vmatpush.msrb.mxu3 %v169_v25  ;;  %v238_v9 = vld [vmem:[%s1996_s1 + $0x5f8] sm:$0xff]  ;;  %v205_v11 = vld [vmem:[%s1996_s1 + $0x4f0] sm:$0xff]  ;;  %v220_v12 = vld [vmem:[%s1996_s1 + $0x568] sm:$0xff] }
  0x30   :  { %466 = vmatpush.msrb.mxu0 %v119_v26  ;;  %485 = vmatpush.msrb.mxu1 %v136_v27  ;;  %v237_v13 = vld [vmem:[%s1996_s1 + $0x5f0] sm:$0xff]  ;;  %v187_v14 = vld [vmem:[%s1996_s1 + $0x460] sm:$0xff]  ;;  %v204_v15 = vld [vmem:[%s1996_s1 + $0x4e8] sm:$0xff] }
  0x31   :  { %506 = vmatpush.msrb.mxu2 %v151_v28  ;;  %525 = vmatpush.msrb.mxu3 %v168_v29  ;;  %v219_v16 = vld [vmem:[%s1996_s1 + $0x560] sm:$0xff]  ;;  %v236_v17 = vld [vmem:[%s1996_s1 + $0x5e8] sm:$0xff]  ;;  %v32_v18 = vld [vmem:[%s1997_s0 + $0x30] sm:$0xff] }
  0x32   :  { %467 = vmatpush.msrb.mxu0 %v118_v30  ;;  %486 = vmatpush.msrb.mxu1 %v135_v31  ;;  %v186_v19 = vld [vmem:[%s1996_s1 + $0x458] sm:$0xff]  ;;  %v203_v20 = vld [vmem:[%s1996_s1 + $0x4e0] sm:$0xff]  ;;  %v185_v25 = vld [vmem:[%s1996_s1 + $0x450] sm:$0xff] }
  0x33   :  { %507 = vmatpush.msrb.mxu2 %v150_v32  ;;  %526 = vmatpush.msrb.mxu3 %v167_v33  ;;  %v218_v21 = vld [vmem:[%s1996_s1 + $0x558] sm:$0xff]  ;;  %v235_v22 = vld [vmem:[%s1996_s1 + $0x5e0] sm:$0xff]  ;;  %v217_v27 = vld [vmem:[%s1996_s1 + $0x550] sm:$0xff] }
  0x34   :  { %468 = vmatpush.msrb.mxu0 %v117_v34  ;;  %487 = vmatpush.msrb.mxu1 %v134_v35  ;;  %v30_v23 = vld [vmem:[%s1997_s0 + $0x20] sm:$0xff]  ;;  %v33_v24 = vld [vmem:[%s1997_s0 + $0x38] sm:$0xff]  ;;  %v31_v29 = vld [vmem:[%s1997_s0 + $0x28] sm:$0xff] }
  0x35   :  { %508 = vmatpush.msrb.mxu2 %v149_v36  ;;  %527 = vmatpush.msrb.mxu3 %v166_v37  ;;  %v202_v26 = vld [vmem:[%s1996_s1 + $0x4d8] sm:$0xff]  ;;  %v184_v30 = vld [vmem:[%s1996_s1 + $0x448] sm:$0xff]  ;;  %v201_v31 = vld [vmem:[%s1996_s1 + $0x4d0] sm:$0xff] }
  0x36   :  { %469 = vmatpush.msrb.mxu0 %v116_v38  ;;  %488 = vmatpush.msrb.mxu1 %v133_v39  ;;  %v234_v28 = vld [vmem:[%s1996_s1 + $0x5d8] sm:$0xff]  ;;  %v216_v32 = vld [vmem:[%s1996_s1 + $0x548] sm:$0xff]  ;;  %v233_v33 = vld [vmem:[%s1996_s1 + $0x5d0] sm:$0xff] }
  0x37   :  { %509 = vmatpush.msrb.mxu2 %v148_v40  ;;  %528 = vmatpush.msrb.mxu3 %v165_v41  ;;  %v183_v34 = vld [vmem:[%s1996_s1 + $0x440] sm:$0xff]  ;;  %v200_v35 = vld [vmem:[%s1996_s1 + $0x4c8] sm:$0xff]  ;;  %v182_v38 = vld [vmem:[%s1996_s1 + $0x438] sm:$0xff] }
  0x38   :  { %470 = vmatpush.msrb.mxu0 %v115_v42  ;;  %489 = vmatpush.msrb.mxu1 %v132_v43  ;;  %v215_v36 = vld [vmem:[%s1996_s1 + $0x540] sm:$0xff]  ;;  %v232_v37 = vld [vmem:[%s1996_s1 + $0x5c8] sm:$0xff]  ;;  %v214_v40 = vld [vmem:[%s1996_s1 + $0x538] sm:$0xff] }
  0x39   :  { %510 = vmatpush.msrb.mxu2 %v147_v44  ;;  %529 = vmatpush.msrb.mxu3 %v164_v45  ;;  %v199_v39 = vld [vmem:[%s1996_s1 + $0x4c0] sm:$0xff]  ;;  %v181_v42 = vld [vmem:[%s1996_s1 + $0x430] sm:$0xff]  ;;  %v198_v43 = vld [vmem:[%s1996_s1 + $0x4b8] sm:$0xff] }
  0x3a   :  { %471 = vmatpush.msrb.mxu0 %v114_v46  ;;  %490 = vmatpush.msrb.mxu1 %v131_v47  ;;  %v231_v41 = vld [vmem:[%s1996_s1 + $0x5c0] sm:$0xff]  ;;  %v213_v44 = vld [vmem:[%s1996_s1 + $0x530] sm:$0xff]  ;;  %v230_v45 = vld [vmem:[%s1996_s1 + $0x5b8] sm:$0xff] }
  0x3b   :  { %511 = vmatpush.msrb.mxu2 %v146_v48  ;;  %530 = vmatpush.msrb.mxu3 %v163_v49  ;;  %v180_v46 = vld [vmem:[%s1996_s1 + $0x428] sm:$0xff]  ;;  %v197_v47 = vld [vmem:[%s1996_s1 + $0x4b0] sm:$0xff] }
  0x3c   :  { %472 = vmatpush.msrb.mxu0 %v113_v50  ;;  %491 = vmatpush.msrb.mxu1 %v130_v51  ;;  %v212_v48 = vld [vmem:[%s1996_s1 + $0x528] sm:$0xff]  ;;  %v229_v49 = vld [vmem:[%s1996_s1 + $0x5b0] sm:$0xff]  ;;  %v179_v50 = vld [vmem:[%s1996_s1 + $0x420] sm:$0xff] }
  0x3d   :  { %512 = vmatpush.msrb.mxu2 %v145_v52  ;;  %531 = vmatpush.msrb.mxu3 %v162_v53  ;;  %v196_v51 = vld [vmem:[%s1996_s1 + $0x4a8] sm:$0xff]  ;;  %v211_v52 = vld [vmem:[%s1996_s1 + $0x520] sm:$0xff] }
  0x3e   :  { %473 = vmatpush.msrb.mxu0 %v112_v54  ;;  %492 = vmatpush.msrb.mxu1 %v129_v55  ;;  %v228_v53 = vld [vmem:[%s1996_s1 + $0x5a8] sm:$0xff]  ;;  %v178_v54 = vld [vmem:[%s1996_s1 + $0x418] sm:$0xff]  ;;  %v195_v55 = vld [vmem:[%s1996_s1 + $0x4a0] sm:$0xff] }
  0x3f   :  { %513 = vmatpush.msrb.mxu2 %v144_v56  ;;  %532 = vmatpush.msrb.mxu3 %v161_v57  ;;  %v210_v56 = vld [vmem:[%s1996_s1 + $0x518] sm:$0xff]  ;;  %v227_v57 = vld [vmem:[%s1996_s1 + $0x5a0] sm:$0xff] }
  0x40   :  { %474 = vmatpush.msrb.mxu0 %v111_v58  ;;  %493 = vmatpush.msrb.mxu1 %v128_v59  ;;  %v177_v58 = vld [vmem:[%s1996_s1 + $0x410] sm:$0xff]  ;;  %v194_v59 = vld [vmem:[%s1996_s1 + $0x498] sm:$0xff] }
  0x41   :  { %514 = vmatpush.msrb.mxu2 %v143_v60  ;;  %533 = vmatpush.msrb.mxu3 %v160_v61  ;;  %v209_v60 = vld [vmem:[%s1996_s1 + $0x510] sm:$0xff]  ;;  %v226_v61 = vld [vmem:[%s1996_s1 + $0x598] sm:$0xff] }
  0x42   :  { %395 = vmatmul.f32.vlgmr.msra.gmra.mxu0 %v26_v62  ;;  %435 = vmatmul.f32.vlgmr.msra.gmra.mxu2 %v28_v63  ;;  %v176_v62 = vld [vmem:[%s1996_s1 + $0x408] sm:$0xff]  ;;  %v193_v63 = vld [vmem:[%s1996_s1 + $0x490] sm:$0xff] }
  0x43   :  { %539 = vmatpush.msra.mxu0 %v190_v0  ;;  %579 = vmatpush.msra.mxu2 %v222_v1  ;;  %v208_v0 = vld [vmem:[%s1996_s1 + $0x508] sm:$0xff]  ;;  %v225_v1 = vld [vmem:[%s1996_s1 + $0x590] sm:$0xff] }
  0x44   :  { %494 = vmatpush.msrb.mxu1 %v127_v2  ;;  %534 = vmatpush.msrb.mxu3 %v159_v3  ;;  %v175_v2 = vld [vmem:[%s1996_s1 + $0x400] sm:$0xff]  ;;  %v192_v3 = vld [vmem:[%s1996_s1 + $0x488] sm:$0xff] }
  0x45   :  { %415 = vmatmul.f32.vlgmr.msra.gmra.mxu1 %v27_v4  ;;  %455 = vmatmul.f32.vlgmr.msra.gmra.mxu3 %v29_v5  ;;  %v207_v4 = vld [vmem:[%s1996_s1 + $0x500] sm:$0xff]  ;;  %v224_v5 = vld [vmem:[%s1996_s1 + $0x588] sm:$0xff] }
  0x46   :  { %540 = vmatpush.msra.mxu0 %v189_v6  ;;  %559 = vmatpush.msra.mxu1 %v206_v7  ;;  %v34_v6 = vld [vmem:[%s1997_s0 + $0x40] sm:$0xff]  ;;  %v36_v7 = vld [vmem:[%s1997_s0 + $0x50] sm:$0xff] }
  0x47   :  { %580 = vmatpush.msra.mxu2 %v221_v8  ;;  %599 = vmatpush.msra.mxu3 %v238_v9  ;;  %v254_v8 = vld [vmem:[%s1996_s1 + $0x678] sm:$0xff] }
  0x48   :  { %541 = vmatpush.msra.mxu0 %v188_v10  ;;  %560 = vmatpush.msra.mxu1 %v205_v11  ;;  %v286_v9 = vld [vmem:[%s1996_s1 + $0x778] sm:$0xff]  ;;  %v191_v10 = vld [vmem:[%s1996_s1 + $0x480] sm:$0xff] }
  0x49   :  { %581 = vmatpush.msra.mxu2 %v220_v12  ;;  %600 = vmatpush.msra.mxu3 %v237_v13  ;;  %v223_v11 = vld [vmem:[%s1996_s1 + $0x580] sm:$0xff]  ;;  %v35_v12 = vld [vmem:[%s1997_s0 + $0x48] sm:$0xff]  ;;  %v37_v13 = vld [vmem:[%s1997_s0 + $0x58] sm:$0xff] }
  0x4a   :  { %542 = vmatpush.msra.mxu0 %v187_v14  ;;  %561 = vmatpush.msra.mxu1 %v204_v15  ;;  %v253_v14 = vld [vmem:[%s1996_s1 + $0x670] sm:$0xff]  ;;  %v270_v15 = vld [vmem:[%s1996_s1 + $0x6f8] sm:$0xff] }
  0x4b   :  { %582 = vmatpush.msra.mxu2 %v219_v16  ;;  %601 = vmatpush.msra.mxu3 %v236_v17  ;;  %v285_v16 = vld [vmem:[%s1996_s1 + $0x770] sm:$0xff]  ;;  %v302_v17 = vld [vmem:[%s1996_s1 + $0x7f8] sm:$0xff] }
  0x4c   :  { %515 = vmatmul.f32.vlgmr.msrb.gmra.mxu2 %v32_v18  ;;  %543 = vmatpush.msra.mxu0 %v186_v19  ;;  %v252_v18 = vld [vmem:[%s1996_s1 + $0x668] sm:$0xff]  ;;  %v269_v19 = vld [vmem:[%s1996_s1 + $0x6f0] sm:$0xff] }
  0x4d   :  { %562 = vmatpush.msra.mxu1 %v203_v20  ;;  %583 = vmatpush.msra.mxu2 %v218_v21  ;;  %v284_v20 = vld [vmem:[%s1996_s1 + $0x768] sm:$0xff]  ;;  %v301_v21 = vld [vmem:[%s1996_s1 + $0x7f0] sm:$0xff] }
  0x4e   :  { %602 = vmatpush.msra.mxu3 %v235_v22  ;;  %475 = vmatmul.f32.vlgmr.msrb.gmra.mxu0 %v30_v23  ;;  %v251_v22 = vld [vmem:[%s1996_s1 + $0x660] sm:$0xff]  ;;  %v268_v23 = vld [vmem:[%s1996_s1 + $0x6e8] sm:$0xff] }
  0x4f   :  { %535 = vmatmul.f32.vlgmr.msrb.gmra.mxu3 %v33_v24  ;;  %544 = vmatpush.msra.mxu0 %v185_v25  ;;  %v283_v24 = vld [vmem:[%s1996_s1 + $0x760] sm:$0xff]  ;;  %v300_v25 = vld [vmem:[%s1996_s1 + $0x7e8] sm:$0xff] }
  0x50   :  { %563 = vmatpush.msra.mxu1 %v202_v26  ;;  %584 = vmatpush.msra.mxu2 %v217_v27  ;;  %v250_v26 = vld [vmem:[%s1996_s1 + $0x658] sm:$0xff]  ;;  %v267_v27 = vld [vmem:[%s1996_s1 + $0x6e0] sm:$0xff] }
  0x51   :  { %603 = vmatpush.msra.mxu3 %v234_v28  ;;  %495 = vmatmul.f32.vlgmr.msrb.gmra.mxu1 %v31_v29  ;;  %v282_v28 = vld [vmem:[%s1996_s1 + $0x758] sm:$0xff]  ;;  %v299_v29 = vld [vmem:[%s1996_s1 + $0x7e0] sm:$0xff] }
  0x52   :  { %545 = vmatpush.msra.mxu0 %v184_v30  ;;  %564 = vmatpush.msra.mxu1 %v201_v31  ;;  %v249_v30 = vld [vmem:[%s1996_s1 + $0x650] sm:$0xff]  ;;  %v266_v31 = vld [vmem:[%s1996_s1 + $0x6d8] sm:$0xff] }
  0x53   :  { %585 = vmatpush.msra.mxu2 %v216_v32  ;;  %604 = vmatpush.msra.mxu3 %v233_v33  ;;  %v281_v32 = vld [vmem:[%s1996_s1 + $0x750] sm:$0xff]  ;;  %v298_v33 = vld [vmem:[%s1996_s1 + $0x7d8] sm:$0xff] }
  0x54   :  { %546 = vmatpush.msra.mxu0 %v183_v34  ;;  %565 = vmatpush.msra.mxu1 %v200_v35  ;;  %v248_v34 = vld [vmem:[%s1996_s1 + $0x648] sm:$0xff]  ;;  %v265_v35 = vld [vmem:[%s1996_s1 + $0x6d0] sm:$0xff] }
  0x55   :  { %586 = vmatpush.msra.mxu2 %v215_v36  ;;  %605 = vmatpush.msra.mxu3 %v232_v37  ;;  %v280_v36 = vld [vmem:[%s1996_s1 + $0x748] sm:$0xff]  ;;  %v297_v37 = vld [vmem:[%s1996_s1 + $0x7d0] sm:$0xff] }
  0x56   :  { %547 = vmatpush.msra.mxu0 %v182_v38  ;;  %566 = vmatpush.msra.mxu1 %v199_v39  ;;  %v247_v38 = vld [vmem:[%s1996_s1 + $0x640] sm:$0xff]  ;;  %v264_v39 = vld [vmem:[%s1996_s1 + $0x6c8] sm:$0xff] }
  0x57   :  { %587 = vmatpush.msra.mxu2 %v214_v40  ;;  %606 = vmatpush.msra.mxu3 %v231_v41  ;;  %v279_v40 = vld [vmem:[%s1996_s1 + $0x740] sm:$0xff]  ;;  %v296_v41 = vld [vmem:[%s1996_s1 + $0x7c8] sm:$0xff] }
  0x58   :  { %548 = vmatpush.msra.mxu0 %v181_v42  ;;  %567 = vmatpush.msra.mxu1 %v198_v43  ;;  %v246_v42 = vld [vmem:[%s1996_s1 + $0x638] sm:$0xff]  ;;  %v263_v43 = vld [vmem:[%s1996_s1 + $0x6c0] sm:$0xff] }
  0x59   :  { %588 = vmatpush.msra.mxu2 %v213_v44  ;;  %607 = vmatpush.msra.mxu3 %v230_v45  ;;  %v278_v44 = vld [vmem:[%s1996_s1 + $0x738] sm:$0xff]  ;;  %v295_v45 = vld [vmem:[%s1996_s1 + $0x7c0] sm:$0xff] }
  0x5a   :  { %549 = vmatpush.msra.mxu0 %v180_v46  ;;  %568 = vmatpush.msra.mxu1 %v197_v47  ;;  %v245_v46 = vld [vmem:[%s1996_s1 + $0x630] sm:$0xff]  ;;  %v262_v47 = vld [vmem:[%s1996_s1 + $0x6b8] sm:$0xff] }
  0x5b   :  { %589 = vmatpush.msra.mxu2 %v212_v48  ;;  %608 = vmatpush.msra.mxu3 %v229_v49  ;;  %v277_v48 = vld [vmem:[%s1996_s1 + $0x730] sm:$0xff]  ;;  %v294_v49 = vld [vmem:[%s1996_s1 + $0x7b8] sm:$0xff] }
  0x5c   :  { %550 = vmatpush.msra.mxu0 %v179_v50  ;;  %569 = vmatpush.msra.mxu1 %v196_v51  ;;  %v244_v50 = vld [vmem:[%s1996_s1 + $0x628] sm:$0xff]  ;;  %v261_v51 = vld [vmem:[%s1996_s1 + $0x6b0] sm:$0xff] }
  0x5d   :  { %590 = vmatpush.msra.mxu2 %v211_v52  ;;  %609 = vmatpush.msra.mxu3 %v228_v53  ;;  %v276_v52 = vld [vmem:[%s1996_s1 + $0x728] sm:$0xff]  ;;  %v293_v53 = vld [vmem:[%s1996_s1 + $0x7b0] sm:$0xff] }
  0x5e   :  { %551 = vmatpush.msra.mxu0 %v178_v54  ;;  %570 = vmatpush.msra.mxu1 %v195_v55  ;;  %v243_v54 = vld [vmem:[%s1996_s1 + $0x620] sm:$0xff]  ;;  %v260_v55 = vld [vmem:[%s1996_s1 + $0x6a8] sm:$0xff] }
  0x5f   :  { %591 = vmatpush.msra.mxu2 %v210_v56  ;;  %610 = vmatpush.msra.mxu3 %v227_v57  ;;  %v275_v56 = vld [vmem:[%s1996_s1 + $0x720] sm:$0xff]  ;;  %v292_v57 = vld [vmem:[%s1996_s1 + $0x7a8] sm:$0xff] }
  0x60   :  { %552 = vmatpush.msra.mxu0 %v177_v58  ;;  %571 = vmatpush.msra.mxu1 %v194_v59  ;;  %v242_v58 = vld [vmem:[%s1996_s1 + $0x618] sm:$0xff]  ;;  %v259_v59 = vld [vmem:[%s1996_s1 + $0x6a0] sm:$0xff] }
  0x61   :  { %592 = vmatpush.msra.mxu2 %v209_v60  ;;  %611 = vmatpush.msra.mxu3 %v226_v61  ;;  %v274_v60 = vld [vmem:[%s1996_s1 + $0x718] sm:$0xff]  ;;  %v291_v61 = vld [vmem:[%s1996_s1 + $0x7a0] sm:$0xff] }
  0x62   :  { %553 = vmatpush.msra.mxu0 %v176_v62  ;;  %572 = vmatpush.msra.mxu1 %v193_v63  ;;  %v241_v62 = vld [vmem:[%s1996_s1 + $0x610] sm:$0xff]  ;;  %v258_v63 = vld [vmem:[%s1996_s1 + $0x698] sm:$0xff] }
  0x63   :  { %593 = vmatpush.msra.mxu2 %v208_v0  ;;  %612 = vmatpush.msra.mxu3 %v225_v1  ;;  %v273_v0 = vld [vmem:[%s1996_s1 + $0x710] sm:$0xff]  ;;  %v290_v1 = vld [vmem:[%s1996_s1 + $0x798] sm:$0xff] }
  0x64   :  { %554 = vmatpush.msra.mxu0 %v175_v2  ;;  %573 = vmatpush.msra.mxu1 %v192_v3  ;;  %v240_v2 = vld [vmem:[%s1996_s1 + $0x608] sm:$0xff]  ;;  %v257_v3 = vld [vmem:[%s1996_s1 + $0x690] sm:$0xff] }
  0x65   :  { %594 = vmatpush.msra.mxu2 %v207_v4  ;;  %613 = vmatpush.msra.mxu3 %v224_v5  ;;  %v272_v4 = vld [vmem:[%s1996_s1 + $0x708] sm:$0xff]  ;;  %v289_v5 = vld [vmem:[%s1996_s1 + $0x790] sm:$0xff] }
  0x66   :  { %555 = vmatmul.f32.vlgmr.msra.gmra.mxu0 %v34_v6  ;;  %595 = vmatmul.f32.vlgmr.msra.gmra.mxu2 %v36_v7  ;;  %v239_v6 = vld [vmem:[%s1996_s1 + $0x600] sm:$0xff]  ;;  %v256_v7 = vld [vmem:[%s1996_s1 + $0x688] sm:$0xff] }
  0x67   :  { %619 = vmatpush.msrb.mxu0 %v254_v8  ;;  %659 = vmatpush.msrb.mxu2 %v286_v9  ;;  %v271_v8 = vld [vmem:[%s1996_s1 + $0x700] sm:$0xff]  ;;  %v288_v9 = vld [vmem:[%s1996_s1 + $0x788] sm:$0xff] }
  0x68   :  { %574 = vmatpush.msra.mxu1 %v191_v10  ;;  %614 = vmatpush.msra.mxu3 %v223_v11  ;;  %v38_v10 = vld [vmem:[%s1997_s0 + $0x60] sm:$0xff]  ;;  %v40_v11 = vld [vmem:[%s1997_s0 + $0x70] sm:$0xff] }
  0x69   :  { %575 = vmatmul.f32.vlgmr.msra.gmra.mxu1 %v35_v12  ;;  %615 = vmatmul.f32.vlgmr.msra.gmra.mxu3 %v37_v13  ;;  %v318_v12 = vld [vmem:[%s1996_s1 + $0x878] sm:$0xff] }
  0x6a   :  { %620 = vmatpush.msrb.mxu0 %v253_v14  ;;  %639 = vmatpush.msrb.mxu1 %v270_v15  ;;  %v350_v13 = vld [vmem:[%s1996_s1 + $0x978] sm:$0xff]  ;;  %v255_v14 = vld [vmem:[%s1996_s1 + $0x680] sm:$0xff] }
  0x6b   :  { %660 = vmatpush.msrb.mxu2 %v285_v16  ;;  %679 = vmatpush.msrb.mxu3 %v302_v17  ;;  %v287_v15 = vld [vmem:[%s1996_s1 + $0x780] sm:$0xff]  ;;  %v39_v16 = vld [vmem:[%s1997_s0 + $0x68] sm:$0xff]  ;;  %v41_v17 = vld [vmem:[%s1997_s0 + $0x78] sm:$0xff] }
  0x6c   :  { %621 = vmatpush.msrb.mxu0 %v252_v18  ;;  %640 = vmatpush.msrb.mxu1 %v269_v19  ;;  %v317_v18 = vld [vmem:[%s1996_s1 + $0x870] sm:$0xff]  ;;  %v334_v19 = vld [vmem:[%s1996_s1 + $0x8f8] sm:$0xff] }
  0x6d   :  { %661 = vmatpush.msrb.mxu2 %v284_v20  ;;  %680 = vmatpush.msrb.mxu3 %v301_v21  ;;  %v349_v20 = vld [vmem:[%s1996_s1 + $0x970] sm:$0xff]  ;;  %v366_v21 = vld [vmem:[%s1996_s1 + $0x9f8] sm:$0xff] }
  0x6e   :  { %622 = vmatpush.msrb.mxu0 %v251_v22  ;;  %641 = vmatpush.msrb.mxu1 %v268_v23  ;;  %v316_v22 = vld [vmem:[%s1996_s1 + $0x868] sm:$0xff]  ;;  %v333_v23 = vld [vmem:[%s1996_s1 + $0x8f0] sm:$0xff] }
  0x6f   :  { %662 = vmatpush.msrb.mxu2 %v283_v24  ;;  %681 = vmatpush.msrb.mxu3 %v300_v25  ;;  %v348_v24 = vld [vmem:[%s1996_s1 + $0x968] sm:$0xff]  ;;  %v365_v25 = vld [vmem:[%s1996_s1 + $0x9f0] sm:$0xff] }
  0x70   :  { %623 = vmatpush.msrb.mxu0 %v250_v26  ;;  %642 = vmatpush.msrb.mxu1 %v267_v27  ;;  %v315_v26 = vld [vmem:[%s1996_s1 + $0x860] sm:$0xff]  ;;  %v332_v27 = vld [vmem:[%s1996_s1 + $0x8e8] sm:$0xff] }
  0x71   :  { %663 = vmatpush.msrb.mxu2 %v282_v28  ;;  %682 = vmatpush.msrb.mxu3 %v299_v29  ;;  %v347_v28 = vld [vmem:[%s1996_s1 + $0x960] sm:$0xff]  ;;  %v364_v29 = vld [vmem:[%s1996_s1 + $0x9e8] sm:$0xff] }
  0x72   :  { %624 = vmatpush.msrb.mxu0 %v249_v30  ;;  %643 = vmatpush.msrb.mxu1 %v266_v31  ;;  %v314_v30 = vld [vmem:[%s1996_s1 + $0x858] sm:$0xff]  ;;  %v331_v31 = vld [vmem:[%s1996_s1 + $0x8e0] sm:$0xff] }
  0x73   :  { %664 = vmatpush.msrb.mxu2 %v281_v32  ;;  %683 = vmatpush.msrb.mxu3 %v298_v33  ;;  %v346_v32 = vld [vmem:[%s1996_s1 + $0x958] sm:$0xff]  ;;  %v363_v33 = vld [vmem:[%s1996_s1 + $0x9e0] sm:$0xff] }
  0x74   :  { %625 = vmatpush.msrb.mxu0 %v248_v34  ;;  %644 = vmatpush.msrb.mxu1 %v265_v35  ;;  %v313_v34 = vld [vmem:[%s1996_s1 + $0x850] sm:$0xff]  ;;  %v330_v35 = vld [vmem:[%s1996_s1 + $0x8d8] sm:$0xff] }
  0x75   :  { %665 = vmatpush.msrb.mxu2 %v280_v36  ;;  %684 = vmatpush.msrb.mxu3 %v297_v37  ;;  %v345_v36 = vld [vmem:[%s1996_s1 + $0x950] sm:$0xff]  ;;  %v362_v37 = vld [vmem:[%s1996_s1 + $0x9d8] sm:$0xff] }
  0x76   :  { %626 = vmatpush.msrb.mxu0 %v247_v38  ;;  %645 = vmatpush.msrb.mxu1 %v264_v39  ;;  %v312_v38 = vld [vmem:[%s1996_s1 + $0x848] sm:$0xff]  ;;  %v329_v39 = vld [vmem:[%s1996_s1 + $0x8d0] sm:$0xff] }
  0x77   :  { %666 = vmatpush.msrb.mxu2 %v279_v40  ;;  %685 = vmatpush.msrb.mxu3 %v296_v41  ;;  %v344_v40 = vld [vmem:[%s1996_s1 + $0x948] sm:$0xff]  ;;  %v361_v41 = vld [vmem:[%s1996_s1 + $0x9d0] sm:$0xff] }
  0x78   :  { %627 = vmatpush.msrb.mxu0 %v246_v42  ;;  %646 = vmatpush.msrb.mxu1 %v263_v43  ;;  %v311_v42 = vld [vmem:[%s1996_s1 + $0x840] sm:$0xff]  ;;  %v328_v43 = vld [vmem:[%s1996_s1 + $0x8c8] sm:$0xff] }
  0x79   :  { %667 = vmatpush.msrb.mxu2 %v278_v44  ;;  %686 = vmatpush.msrb.mxu3 %v295_v45  ;;  %v343_v44 = vld [vmem:[%s1996_s1 + $0x940] sm:$0xff]  ;;  %v360_v45 = vld [vmem:[%s1996_s1 + $0x9c8] sm:$0xff] }
  0x7a   :  { %628 = vmatpush.msrb.mxu0 %v245_v46  ;;  %647 = vmatpush.msrb.mxu1 %v262_v47  ;;  %v310_v46 = vld [vmem:[%s1996_s1 + $0x838] sm:$0xff]  ;;  %v327_v47 = vld [vmem:[%s1996_s1 + $0x8c0] sm:$0xff] }
  0x7b   :  { %668 = vmatpush.msrb.mxu2 %v277_v48  ;;  %687 = vmatpush.msrb.mxu3 %v294_v49  ;;  %v342_v48 = vld [vmem:[%s1996_s1 + $0x938] sm:$0xff]  ;;  %v359_v49 = vld [vmem:[%s1996_s1 + $0x9c0] sm:$0xff] }
  0x7c   :  { %629 = vmatpush.msrb.mxu0 %v244_v50  ;;  %648 = vmatpush.msrb.mxu1 %v261_v51  ;;  %v309_v50 = vld [vmem:[%s1996_s1 + $0x830] sm:$0xff]  ;;  %v326_v51 = vld [vmem:[%s1996_s1 + $0x8b8] sm:$0xff] }
  0x7d   :  { %669 = vmatpush.msrb.mxu2 %v276_v52  ;;  %688 = vmatpush.msrb.mxu3 %v293_v53  ;;  %v341_v52 = vld [vmem:[%s1996_s1 + $0x930] sm:$0xff]  ;;  %v358_v53 = vld [vmem:[%s1996_s1 + $0x9b8] sm:$0xff] }
  0x7e   :  { %630 = vmatpush.msrb.mxu0 %v243_v54  ;;  %649 = vmatpush.msrb.mxu1 %v260_v55  ;;  %v308_v54 = vld [vmem:[%s1996_s1 + $0x828] sm:$0xff]  ;;  %v325_v55 = vld [vmem:[%s1996_s1 + $0x8b0] sm:$0xff] }
  0x7f   :  { %670 = vmatpush.msrb.mxu2 %v275_v56  ;;  %689 = vmatpush.msrb.mxu3 %v292_v57  ;;  %v340_v56 = vld [vmem:[%s1996_s1 + $0x928] sm:$0xff]  ;;  %v357_v57 = vld [vmem:[%s1996_s1 + $0x9b0] sm:$0xff] }
  0x80   :  { %631 = vmatpush.msrb.mxu0 %v242_v58  ;;  %650 = vmatpush.msrb.mxu1 %v259_v59  ;;  %v307_v58 = vld [vmem:[%s1996_s1 + $0x820] sm:$0xff]  ;;  %v324_v59 = vld [vmem:[%s1996_s1 + $0x8a8] sm:$0xff] }
  0x81   :  { %671 = vmatpush.msrb.mxu2 %v274_v60  ;;  %690 = vmatpush.msrb.mxu3 %v291_v61  ;;  %v339_v60 = vld [vmem:[%s1996_s1 + $0x920] sm:$0xff]  ;;  %v356_v61 = vld [vmem:[%s1996_s1 + $0x9a8] sm:$0xff] }
  0x82   :  { %632 = vmatpush.msrb.mxu0 %v241_v62  ;;  %651 = vmatpush.msrb.mxu1 %v258_v63  ;;  %v306_v62 = vld [vmem:[%s1996_s1 + $0x818] sm:$0xff]  ;;  %v323_v63 = vld [vmem:[%s1996_s1 + $0x8a0] sm:$0xff] }
  0x83   :  { %672 = vmatpush.msrb.mxu2 %v273_v0  ;;  %691 = vmatpush.msrb.mxu3 %v290_v1  ;;  %v338_v0 = vld [vmem:[%s1996_s1 + $0x918] sm:$0xff]  ;;  %v355_v1 = vld [vmem:[%s1996_s1 + $0x9a0] sm:$0xff] }
  0x84   :  { %633 = vmatpush.msrb.mxu0 %v240_v2  ;;  %652 = vmatpush.msrb.mxu1 %v257_v3  ;;  %v305_v2 = vld [vmem:[%s1996_s1 + $0x810] sm:$0xff]  ;;  %v322_v3 = vld [vmem:[%s1996_s1 + $0x898] sm:$0xff] }
  0x85   :  { %673 = vmatpush.msrb.mxu2 %v272_v4  ;;  %692 = vmatpush.msrb.mxu3 %v289_v5  ;;  %v337_v4 = vld [vmem:[%s1996_s1 + $0x910] sm:$0xff]  ;;  %v354_v5 = vld [vmem:[%s1996_s1 + $0x998] sm:$0xff] }
  0x86   :  { %634 = vmatpush.msrb.mxu0 %v239_v6  ;;  %653 = vmatpush.msrb.mxu1 %v256_v7  ;;  %v304_v6 = vld [vmem:[%s1996_s1 + $0x808] sm:$0xff]  ;;  %v321_v7 = vld [vmem:[%s1996_s1 + $0x890] sm:$0xff] }
  0x87   :  { %674 = vmatpush.msrb.mxu2 %v271_v8  ;;  %693 = vmatpush.msrb.mxu3 %v288_v9  ;;  %v336_v8 = vld [vmem:[%s1996_s1 + $0x908] sm:$0xff]  ;;  %v353_v9 = vld [vmem:[%s1996_s1 + $0x990] sm:$0xff] }
  0x88   :  { %635 = vmatmul.f32.vlgmr.msrb.gmra.mxu0 %v38_v10  ;;  %675 = vmatmul.f32.vlgmr.msrb.gmra.mxu2 %v40_v11  ;;  %v303_v10 = vld [vmem:[%s1996_s1 + $0x800] sm:$0xff]  ;;  %v320_v11 = vld [vmem:[%s1996_s1 + $0x888] sm:$0xff] }
  0x89   :  { %699 = vmatpush.msra.mxu0 %v318_v12  ;;  %739 = vmatpush.msra.mxu2 %v350_v13  ;;  %v335_v12 = vld [vmem:[%s1996_s1 + $0x900] sm:$0xff]  ;;  %v352_v13 = vld [vmem:[%s1996_s1 + $0x988] sm:$0xff] }
  0x8a   :  { %654 = vmatpush.msrb.mxu1 %v255_v14  ;;  %694 = vmatpush.msrb.mxu3 %v287_v15  ;;  %v42_v14 = vld [vmem:[%s1997_s0 + $0x80] sm:$0xff]  ;;  %v44_v15 = vld [vmem:[%s1997_s0 + $0x90] sm:$0xff] }
  0x8b   :  { %655 = vmatmul.f32.vlgmr.msrb.gmra.mxu1 %v39_v16  ;;  %695 = vmatmul.f32.vlgmr.msrb.gmra.mxu3 %v41_v17  ;;  %v319_v16 = vld [vmem:[%s1996_s1 + $0x880] sm:$0xff] }
  0x8c   :  { %700 = vmatpush.msra.mxu0 %v317_v18  ;;  %719 = vmatpush.msra.mxu1 %v334_v19  ;;  %v351_v17 = vld [vmem:[%s1996_s1 + $0x980] sm:$0xff]  ;;  %v43_v18 = vld [vmem:[%s1997_s0 + $0x88] sm:$0xff]  ;;  %v45_v19 = vld [vmem:[%s1997_s0 + $0x98] sm:$0xff] }
  0x8d   :  { %740 = vmatpush.msra.mxu2 %v349_v20  ;;  %759 = vmatpush.msra.mxu3 %v366_v21  ;;  %v370_v20 = vld [vmem:[%s1996_s1 + $0xa18] sm:$0xff]  ;;  %v369_v21 = vld [vmem:[%s1996_s1 + $0xa10] sm:$0xff] }
  0x8e   :  { %701 = vmatpush.msra.mxu0 %v316_v22  ;;  %720 = vmatpush.msra.mxu1 %v333_v23  ;;  %v368_v22 = vld [vmem:[%s1996_s1 + $0xa08] sm:$0xff]  ;;  %v367_v23 = vld [vmem:[%s1996_s1 + $0xa00] sm:$0xff] }
  0x8f   :  { %741 = vmatpush.msra.mxu2 %v348_v24  ;;  %760 = vmatpush.msra.mxu3 %v365_v25  ;;  %v46_v24 = vld [vmem:[%s1997_s0 + $0xa0] sm:$0xff] }
  0x90   :  { %702 = vmatpush.msra.mxu0 %v315_v26  ;;  %721 = vmatpush.msra.mxu1 %v332_v27  ;;  %v876_v25 = vld [vmem:[%s1998_s2] ss:$0 sm:$0xff] }
  0x91   :  { %742 = vmatpush.msra.mxu2 %v347_v28  ;;  %761 = vmatpush.msra.mxu3 %v364_v29 }
  0x92   :  { %703 = vmatpush.msra.mxu0 %v314_v30  ;;  %722 = vmatpush.msra.mxu1 %v331_v31 }
  0x93   :  { %743 = vmatpush.msra.mxu2 %v346_v32  ;;  %762 = vmatpush.msra.mxu3 %v363_v33 }
  0x94   :  { %704 = vmatpush.msra.mxu0 %v313_v34  ;;  %723 = vmatpush.msra.mxu1 %v330_v35 }
  0x95   :  { %744 = vmatpush.msra.mxu2 %v345_v36  ;;  %763 = vmatpush.msra.mxu3 %v362_v37 }
  0x96   :  { %705 = vmatpush.msra.mxu0 %v312_v38  ;;  %724 = vmatpush.msra.mxu1 %v329_v39  ;;  %v807_v38 = vld [vmem:[%s2000_s3 + $0x38] sm:$0xff] }
  0x97   :  { %745 = vmatpush.msra.mxu2 %v344_v40  ;;  %764 = vmatpush.msra.mxu3 %v361_v41  ;;  %v806_v40 = vld [vmem:[%s2000_s3 + $0x30] sm:$0xff] }
  0x98   :  { %706 = vmatpush.msra.mxu0 %v311_v42  ;;  %725 = vmatpush.msra.mxu1 %v328_v43  ;;  %v805_v42 = vld [vmem:[%s2000_s3 + $0x28] sm:$0xff] }
  0x99   :  { %746 = vmatpush.msra.mxu2 %v343_v44  ;;  %765 = vmatpush.msra.mxu3 %v360_v45  ;;  %v804_v44 = vld [vmem:[%s2000_s3 + $0x20] sm:$0xff] }
  0x9a   :  { %707 = vmatpush.msra.mxu0 %v310_v46  ;;  %726 = vmatpush.msra.mxu1 %v327_v47  ;;  %v803_v47 = vld [vmem:[%s2000_s3 + $0x18] sm:$0xff] }
  0x9b   :  { %747 = vmatpush.msra.mxu2 %v342_v48  ;;  %766 = vmatpush.msra.mxu3 %v359_v49  ;;  %v802_v49 = vld [vmem:[%s2000_s3 + $0x10] sm:$0xff] }
  0x9c   :  { %708 = vmatpush.msra.mxu0 %v309_v50  ;;  %727 = vmatpush.msra.mxu1 %v326_v51  ;;  %v801_v51 = vld [vmem:[%s2000_s3 + $0x8] sm:$0xff] }
  0x9d   :  { %748 = vmatpush.msra.mxu2 %v341_v52  ;;  %767 = vmatpush.msra.mxu3 %v358_v53 }
  0x9e   :  { %709 = vmatpush.msra.mxu0 %v308_v54  ;;  %728 = vmatpush.msra.mxu1 %v325_v55  ;;  %v800_v54 = vld [vmem:[%s2000_s3] sm:$0xff] }
  0x9f   :  { %749 = vmatpush.msra.mxu2 %v340_v56  ;;  %768 = vmatpush.msra.mxu3 %v357_v57  ;;  %v838_v56 = vld [vmem:[%s2001_s5 + $0x8] sm:$0xff] }
  0xa0   :  { %710 = vmatpush.msra.mxu0 %v307_v58  ;;  %729 = vmatpush.msra.mxu1 %v324_v59 }
  0xa1   :  { %750 = vmatpush.msra.mxu2 %v339_v60  ;;  %769 = vmatpush.msra.mxu3 %v356_v61 }
  0xa2   :  { %711 = vmatpush.msra.mxu0 %v306_v62  ;;  %730 = vmatpush.msra.mxu1 %v323_v63 }
  0xa3   :  { %751 = vmatpush.msra.mxu2 %v338_v0  ;;  %770 = vmatpush.msra.mxu3 %v355_v1 }
  0xa4   :  { %712 = vmatpush.msra.mxu0 %v305_v2  ;;  %731 = vmatpush.msra.mxu1 %v322_v3 }
  0xa5   :  { %752 = vmatpush.msra.mxu2 %v337_v4  ;;  %771 = vmatpush.msra.mxu3 %v354_v5 }
  0xa6   :  { %713 = vmatpush.msra.mxu0 %v304_v6  ;;  %732 = vmatpush.msra.mxu1 %v321_v7 }
  0xa7   :  { %753 = vmatpush.msra.mxu2 %v336_v8  ;;  %772 = vmatpush.msra.mxu3 %v353_v9 }
  0xa8   :  { %714 = vmatpush.msra.mxu0 %v303_v10  ;;  %733 = vmatpush.msra.mxu1 %v320_v11 }
  0xa9   :  { %754 = vmatpush.msra.mxu2 %v335_v12  ;;  %773 = vmatpush.msra.mxu3 %v352_v13 }
  0xaa   :  { %715 = vmatmul.f32.vlgmr.msra.gmra.mxu0 %v42_v14  ;;  %755 = vmatmul.f32.vlgmr.msra.gmra.mxu2 %v44_v15  ;;  %v837_v14 = vld [vmem:[%s2001_s5] sm:$0xff] }
  0xab   :  { %734 = vmatpush.msra.mxu1 %v319_v16  ;;  %774 = vmatpush.msra.mxu3 %v351_v17  ;;  %v877_v15 = vld [vmem:[%s1999_s4] ss:$0 sm:$0xff] }
  0xac   :  { %735 = vmatmul.f32.vlgmr.msra.gmra.mxu1 %v43_v18  ;;  %775 = vmatmul.f32.vlgmr.msra.gmra.mxu3 %v45_v19  ;;  %v878_v19 = vld [vmem:[%s2002_s6] ss:$0 sm:$0xff] }
  0xad   :  { %791 = vmatpush.msrb.mxu0 %v370_v20  ;;  %824 = vmatpush.msrb.mxu1 %v807_v38 }
  0xae   :  { %861 = vmatpush.msrb.mxu2 %v838_v56 }
  0xaf   :  { %792 = vmatpush.msrb.mxu0 %v369_v21  ;;  %825 = vmatpush.msrb.mxu1 %v806_v40 }
  0xb0   :  { %862 = vmatpush.msrb.mxu2 %v837_v14 }
  0xb1   :  { %793 = vmatpush.msrb.mxu0 %v368_v22  ;;  %826 = vmatpush.msrb.mxu1 %v805_v42 }
  0xb3   :  { %794 = vmatpush.msrb.mxu0 %v367_v23  ;;  %827 = vmatpush.msrb.mxu1 %v804_v44 }
  0xb4   :  { %873 = vmatmul.msk.f32.vlgmr.msrb.gmra.mxu0 %vm375_vm0, %v46_v24 }
  0xb5   :  { %828 = vmatpush.msrb.mxu1 %v803_v47 }
  0xb7   :  { %829 = vmatpush.msrb.mxu1 %v802_v49 }
  0xb9   :  { %830 = vmatpush.msrb.mxu1 %v801_v51 }
  0xbb   :  { %831 = vmatpush.msrb.mxu1 %v800_v54 }
  0xbf   :  { %v396_v26 = vpop.f32.mrf.mxu0 }
  0xc0   :  { %v397_v27 = vadd.f32 %v876_v25, %v396_v26 }
  0xc2   :  { %v416_v28 = vpop.f32.mrf.mxu1 }
  0xc3   :  { %v417_v29 = vadd.f32 %v416_v28, %v397_v27 }
  0xc5   :  { %v436_v30 = vpop.f32.mrf.mxu2 }
  0xc6   :  { %v437_v31 = vadd.f32 %v436_v30, %v417_v29 }
  0xc8   :  { %v456_v32 = vpop.f32.mrf.mxu3 }
  0xc9   :  { %v457_v33 = vadd.f32 %v456_v32, %v437_v31 }
  0xcb   :  { %v476_v34 = vpop.f32.mrf.mxu0 }
  0xcc   :  { %v477_v35 = vadd.f32 %v476_v34, %v457_v33 }
  0xce   :  { %v496_v36 = vpop.f32.mrf.mxu1 }
  0xcf   :  { %v497_v37 = vadd.f32 %v496_v36, %v477_v35  ;;  %v516_v39 = vpop.f32.mrf.mxu2 }
  0xd1   :  { %v517_v41 = vadd.f32 %v516_v39, %v497_v37 }
  0xd2   :  { %v536_v43 = vpop.f32.mrf.mxu3 }
  0xd3   :  { %v537_v46 = vadd.f32 %v536_v43, %v517_v41 }
  0xe3   :  { %v556_v45 = vpop.f32.mrf.mxu0 }
  0xe4   :  { %v557_v48 = vadd.f32 %v556_v45, %v537_v46 }
  0xe6   :  { %v576_v50 = vpop.f32.mrf.mxu1 }
  0xe7   :  { %v577_v53 = vadd.f32 %v576_v50, %v557_v48 }
  0xe9   :  { %v596_v52 = vpop.f32.mrf.mxu2 }
  0xea   :  { %v597_v55 = vadd.f32 %v596_v52, %v577_v53 }
  0xec   :  { %v616_v57 = vpop.f32.mrf.mxu3 }
  0xed   :  { %v617_v59 = vadd.f32 %v616_v57, %v597_v55 }
 0x105   :  { %v636_v58 = vpop.f32.mrf.mxu0 }
 0x106   :  { %v637_v60 = vadd.f32 %v636_v58, %v617_v59 }
 0x108   :  { %v656_v61 = vpop.f32.mrf.mxu1 }
 0x109   :  { %v657_v63 = vadd.f32 %v656_v61, %v637_v60 }
 0x10b   :  { %v676_v62 = vpop.f32.mrf.mxu2 }
 0x10c   :  { %v677_v0 = vadd.f32 %v676_v62, %v657_v63 }
 0x10e   :  { %v696_v1 = vpop.f32.mrf.mxu3 }
 0x10f   :  { %v697_v2 = vadd.f32 %v696_v1, %v677_v0 }
 0x127   :  { %v716_v3 = vpop.f32.mrf.mxu0 }
 0x128   :  { %v717_v4 = vadd.f32 %v716_v3, %v697_v2 }
 0x129   :  { %v736_v5 = vpop.f32.mrf.mxu1 }
 0x12a   :  { %v737_v6 = vadd.f32 %v736_v5, %v717_v4 }
 0x12d   :  { %v756_v7 = vpop.f32.mrf.mxu2 }
 0x12e   :  { %v757_v8 = vadd.f32 %v756_v7, %v737_v6 }
 0x12f   :  { %v776_v9 = vpop.f32.mrf.mxu3 }
 0x130   :  { %v777_v10 = vadd.f32 %v776_v9, %v757_v8 }
 0x131   :  { %v796_v11 = vpop.f32.mrf.mxu0 }
 0x132   :  { %v797_v12 = vadd.f32 %v796_v11, %v777_v10 }
 0x134   :  { %v799_v13 = vmax.f32 %v797_v12, 0.0 }
 0x136   :  { %874 = vmatmul.msk.f32.vlgmr.msrb.gmra.mxu1 %vm812_vm1, %v799_v13 }
 0x1b3   :  { %v833_v16 = vpop.f32.mrf.mxu1 }
 0x1b4   :  { %v834_v17 = vadd.f32 %v877_v15, %v833_v16 }
 0x1b6   :  { %v836_v18 = vmax.f32 %v834_v17, 0.0 }
 0x1b8   :  { %875 = vmatmul.msk.f32.vlgmr.msrb.gmra.mxu2 %vm843_vm2, %v836_v18 }
 0x23b   :  { %v864_v20 = vpop.f32.mrf.mxu2 }
 0x23c   :  { %v865_v21 = vadd.f32 %v878_v19, %v864_v20 }
 0x23e   :  { %868 = vst.msk [vmem:[%s2003_s7] sm:$0xff] %vm867_vm3, %v865_v21 }

</bundles_post_ra>
